<compile_context>
chip_gen: v5e
topology: v5e:2x2
jax: 0.10.0
libtpu: 0.0.40
codegen_flags: <defaults>
</compile_context>

<pallas_src>
import math
from functools import partial

import jax
import jax.numpy as jnp
from jax import lax
from jax.experimental import pallas as pl
from jax.experimental.pallas import tpu as pltpu


def _round_up(x, m):
    return ((x + m - 1) // m) * m


def _pick_tile(n, candidates=(512, 256, 128)):
    for c in candidates:
        if n % c == 0:
            return c
    return n


# ---------------------------------------------------------------------------
# Linear kernel:  o = x @ w + b
#   x block (tm, tk), w block (tk, tn) [already transposed to (K, Nout)],
#   b block (1, tn).  bf16 MXU inputs, f32 VMEM accumulator over the K axis.
# ---------------------------------------------------------------------------
def _linear_kernel(x_ref, w_ref, b_ref, o_ref, acc_ref):
    @pl.when(pl.program_id(2) == 0)
    def _():
        acc_ref[...] = jnp.zeros_like(acc_ref)

    acc_ref[...] += jnp.dot(
        x_ref[...].astype(jnp.bfloat16),
        w_ref[...].astype(jnp.bfloat16),
        preferred_element_type=jnp.float32,
    )

    @pl.when(pl.program_id(2) == pl.num_programs(2) - 1)
    def _():
        o_ref[...] = (acc_ref[...] + b_ref[...]).astype(o_ref.dtype)


def linear_pallas(x2d, w_t, b2, *, max_tile_m=512):
    """(M, K) @ (K, Nout) + (1, Nout) -> (M, Nout).  w_t is pre-transposed."""
    M, K = x2d.shape
    Nout = w_t.shape[1]

    # Row tile: cap at max_tile_m; pad M up instead of ever using one giant
    # un-pipelined block.
    tm = min(max_tile_m, _round_up(M, 8))
    m_pad = _round_up(M, tm)
    x_in = x2d if m_pad == M else jnp.pad(x2d, ((0, m_pad - M), (0, 0)))

    tn = _pick_tile(Nout)   # bound the weight block in VMEM (v7x: 64 MiB/TC)
    tk = _pick_tile(K)
    grid = (m_pad // tm, Nout // tn, K // tk)

    cost = pl.CostEstimate(
        flops=2 * m_pad * K * Nout,
        transcendentals=0,
        bytes_accessed=4 * (m_pad * K + K * Nout + m_pad * Nout),
    )

    out = pl.pallas_call(
        _linear_kernel,
        out_shape=jax.ShapeDtypeStruct((m_pad, Nout), x2d.dtype),
        grid=grid,
        in_specs=[
            pl.BlockSpec((tm, tk), lambda i, j, k: (i, k)),
            pl.BlockSpec((tk, tn), lambda i, j, k: (k, j)),
            pl.BlockSpec((1, tn), lambda i, j, k: (0, j)),
        ],
        out_specs=pl.BlockSpec((tm, tn), lambda i, j, k: (i, j)),
        scratch_shapes=[pltpu.VMEM((tm, tn), jnp.float32)],
        compiler_params=pltpu.CompilerParams(
            dimension_semantics=("parallel", "parallel", "arbitrary")),
        cost_estimate=cost,
    )(x_in, w_t, b2)
    return out if m_pad == M else out[:M]


# ---------------------------------------------------------------------------
# Dual-attention kernel: one (batch, q-tile) per grid step, all heads inside.
#   q block (1, tq, C); k/v blocks (1, Nk, C); heads are lane slices of C.
#   Output written as a single lane-dense (tq, C) tile in (B, Nq, C) layout,
#   exactly what the proj linear consumes (no HBM head transposes anywhere).
# ---------------------------------------------------------------------------
def _dual_attn_kernel(q_ref, k_ref, v_ref, o_ref, *, scale, num_heads):
    Nk = k_ref.shape[1]
    C = q_ref.shape[2]
    hd = C // num_heads

    # Fold scale into q once (Nq*C VPU mults instead of 2*Nq*Nk on the logits).
    q = (q_ref[0] * scale).astype(jnp.bfloat16)      # (tq, C)
    k = k_ref[0].astype(jnp.bfloat16)                # (Nk, C)
    v = v_ref[0].astype(jnp.bfloat16)                # (Nk, C)

    def _softmax(logits):                            # f32 in / f32 out
        m = jnp.max(logits, axis=-1, keepdims=True)
        e = jnp.exp(logits - m)
        denom = jnp.sum(e, axis=-1, keepdims=True)
        return e * pl.reciprocal(denom, approx=True)

    outs = []
    for h in range(num_heads):
        sl = slice(h * hd, (h + 1) * hd)
        qh, kh, vh = q[:, sl], k[:, sl], v[:, sl]
        # Fused dual score matmul: q @ [k; v]^T -> (tq, 2Nk), one MXU push.
        kv = jnp.concatenate([kh, vh], axis=0)                      # (2Nk, hd)
        s = jnp.dot(qh, kv.T, preferred_element_type=jnp.float32)   # (tq, 2Nk)
        p = jnp.concatenate(
            [_softmax(s[:, :Nk]), _softmax(s[:, Nk:])], axis=-1
        ).astype(jnp.bfloat16)                                      # (tq, 2Nk)
        # Fused output matmul: attn @ v + attn_s @ k in one push.
        vk = jnp.concatenate([vh, kh], axis=0)                      # (2Nk, hd)
        outs.append(jnp.dot(p, vk, preferred_element_type=jnp.float32))

    # Single lane-dense store of the full (tq, C) tile.
    o_ref[0] = jnp.concatenate(outs, axis=-1).astype(o_ref.dtype)


def dual_attention_pallas(q, k, v, scale, num_heads):
    """q: (B, Nq, C); k, v: (B, Nk, C) -> (B, Nq, C), heads packed along C."""
    B, Nq, C = q.shape
    Nk = k.shape[1]
    hd = C // num_heads

    # Tile the q axis; keys/values stay resident per batch.
    tq = Nq
    for c in (512, 256, 128):
        if Nq % c == 0:
            tq = c
            break
    grid = (B, Nq // tq)
    # TODO(synk): for very long Nk on v7x (64 MiB VMEM) add flash-style Nk
    # streaming (online softmax with m/l/acc scratch for both attn branches).

    cost = pl.CostEstimate(
        flops=8 * B * num_heads * Nq * Nk * hd,          # 2 fused matmuls/head
        transcendentals=2 * B * num_heads * Nq * Nk,     # the two softmaxes
        bytes_accessed=4 * (2 * B * Nq * C + 2 * B * Nk * C),
    )

    return pl.pallas_call(
        partial(_dual_attn_kernel, scale=scale, num_heads=num_heads),
        out_shape=jax.ShapeDtypeStruct((B, Nq, C), q.dtype),
        grid=grid,
        in_specs=[
            pl.BlockSpec((1, tq, C), lambda b, i: (b, i, 0)),
            pl.BlockSpec((1, Nk, C), lambda b, i: (b, 0, 0)),
            pl.BlockSpec((1, Nk, C), lambda b, i: (b, 0, 0)),
        ],
        out_specs=pl.BlockSpec((1, tq, C), lambda b, i: (b, i, 0)),
        compiler_params=pltpu.CompilerParams(
            dimension_semantics=("parallel", "parallel")),
        cost_estimate=cost,
    )(q, k, v)


# ---------------------------------------------------------------------------
# Module mirror of PyTorch Attention_X2.
# ---------------------------------------------------------------------------
class AttentionX2Pallas:
    def __init__(self, dim, num_heads=8, qkv_bias=False, attn_drop=0.0,
                 proj_drop=0.0, *, key):
        assert dim % num_heads == 0, "dim should be divisible by num_heads"
        self.dim = dim
        self.num_heads = num_heads
        self.head_dim = dim // num_heads
        self.scale = self.head_dim ** (-0.5)
        # TODO(synk): attn_drop / proj_drop > 0 (training dropout) not
        # implemented; the module defaults (0.0) make them identity.
        self.attn_drop = attn_drop
        self.proj_drop = proj_drop

        k1, k2, k3, k4 = jax.random.split(key, 4)
        bound = 1.0 / math.sqrt(dim)
        # Torch-layout parameters (kept for the pure-JAX reference check).
        self.qkv_w = jax.random.uniform(k1, (3 * dim, dim), jnp.float32,
                                        -bound, bound)
        if qkv_bias:
            self.qkv_b = jax.random.uniform(k2, (3 * dim,), jnp.float32,
                                            -bound, bound)
        else:
            self.qkv_b = jnp.zeros((3 * dim,), jnp.float32)
        self.proj_w = jax.random.uniform(k3, (dim, dim), jnp.float32,
                                         -bound, bound)
        self.proj_b = jax.random.uniform(k4, (dim,), jnp.float32,
                                         -bound, bound)

        # Pre-sliced / pre-transposed (K, Nout) weights and (1, Nout) biases:
        # no per-forward weight transpose through HBM.
        C = dim
        self.wq_t = jnp.asarray(self.qkv_w[:C].T)
        self.wk_t = jnp.asarray(self.qkv_w[C:2 * C].T)
        self.wv_t = jnp.asarray(self.qkv_w[2 * C:].T)
        self.bq2 = self.qkv_b[:C].reshape(1, C)
        self.bk2 = self.qkv_b[C:2 * C].reshape(1, C)
        self.bv2 = self.qkv_b[2 * C:].reshape(1, C)
        self.proj_w_t = jnp.asarray(self.proj_w.T)
        self.proj_b2 = self.proj_b.reshape(1, C)

    def __call__(self, x_q, x_k, x_v):
        B, Nq, C = x_q.shape
        Bk, Nk, Ck = x_k.shape
        Bv, Nv, Cv = x_v.shape
        assert B == Bk == Bv and C == Ck == Cv, \
            "Batch size and embedding dimension must match"
        assert Nk == Nv, "attn @ v / attn_s @ k require N_k == N_v"

        # Projections stay in (B, N, C) layout; heads are lane slices of C.
        q = linear_pallas(x_q.reshape(B * Nq, C), self.wq_t, self.bq2)
        k = linear_pallas(x_k.reshape(B * Nk, C), self.wk_t, self.bk2)
        v = linear_pallas(x_v.reshape(B * Nv, C), self.wv_t, self.bv2)
        q = q.reshape(B, Nq, C)
        k = k.reshape(B, Nk, C)
        v = v.reshape(B, Nv, C)

        attn_out = dual_attention_pallas(q, k, v, self.scale, self.num_heads)

        y = linear_pallas(attn_out.reshape(B * Nq, C), self.proj_w_t,
                          self.proj_b2)
        return y.reshape(B, Nq, C)


# ---------------------------------------------------------------------------
# Pure-JAX reference (mirrors the PyTorch forward exactly, full f32).
# ---------------------------------------------------------------------------
def attention_x2_ref(x_q, x_k, x_v, qkv_w, qkv_b, proj_w, proj_b, num_heads):
    B, Nq, C = x_q.shape
    hd = C // num_heads
    scale = hd ** (-0.5)
    hp = lax.Precision.HIGHEST

    def qkv_heads(x, N):
        y = jnp.einsum("nc,oc->no", x.reshape(B * N, C), qkv_w,
                       precision=hp) + qkv_b
        return y.reshape(B, N, 3, num_heads, hd).transpose(2, 0, 3, 1, 4)

    q = qkv_heads(x_q, Nq)[0]
    k = qkv_heads(x_k, x_k.shape[1])[1]
    v = qkv_heads(x_v, x_v.shape[1])[2]

    attn = jax.nn.softmax(
        jnp.einsum("bhqd,bhkd->bhqk", q, k, precision=hp) * scale, axis=-1)
    attn_s = jax.nn.softmax(
        jnp.einsum("bhqd,bhkd->bhqk", q, v, precision=hp) * scale, axis=-1)
    x = (jnp.einsum("bhqk,bhkd->bhqd", attn, v, precision=hp)
         + jnp.einsum("bhqk,bhkd->bhqd", attn_s, k, precision=hp))
    x = x.transpose(0, 2, 1, 3).reshape(B, Nq, C)
    return jnp.einsum("bnc,oc->bno", x, proj_w, precision=hp) + proj_b


if __name__ == "__main__":
    key = jax.random.PRNGKey(0)
    k_mod, k_q, k_k, k_v = jax.random.split(key, 4)

    # Small shapes consistent with the module: batch=2, seq=8, hidden=32.
    B, N, C = 2, 8, 32
    num_heads = 4
    x_q = jax.random.normal(k_q, (B, N, C), dtype=jnp.float32)
    x_k = jax.random.normal(k_k, (B, N, C), dtype=jnp.float32)
    x_v = jax.random.normal(k_v, (B, N, C), dtype=jnp.float32)

    module = AttentionX2Pallas(dim=C, num_heads=num_heads, qkv_bias=False,
                               key=k_mod)

    y = module(x_q, x_k, x_v)
    y = jax.block_until_ready(y)

    y_ref = attention_x2_ref(x_q, x_k, x_v, module.qkv_w, module.qkv_b,
                             module.proj_w, module.proj_b, num_heads)
    y_ref = jax.block_until_ready(y_ref)

    if y.shape != (B, N, C):
        raise SystemExit(f"unexpected output shape {y.shape}")
    # bf16 MXU inputs vs f32 HIGHEST reference -> loosened tolerance.
    if not bool(jnp.allclose(y, y_ref, atol=5e-2, rtol=5e-2)):
        err = float(jnp.max(jnp.abs(y - y_ref)))
        raise SystemExit(f"attention_x2 kernel mismatch, max abs err = {err}")

    print("KERNEL_OK")
</pallas_src>

<mosaic_0001>
module attributes {stable_mosaic.version = 11 : i64} {
  func.func @_linear_kernel(%arg0: i32, %arg1: i32, %arg2: i32, %arg3: memref<16x32xf32, #tpu.memory_space<vmem>>, %arg4: memref<32x32xf32, #tpu.memory_space<vmem>>, %arg5: memref<1x32xf32, #tpu.memory_space<vmem>>, %arg6: memref<16x32xf32, #tpu.memory_space<vmem>>, %arg7: memref<16x32xf32, #tpu.memory_space<vmem>>) attributes {dimension_semantics = [#tpu.dimension_semantics<parallel>, #tpu.dimension_semantics<parallel>, #tpu.dimension_semantics<arbitrary>], iteration_bounds = array<i64: 1, 1, 1>, scalar_prefetch = 0 : i64, scratch_operands = 1 : i64, tpu.core_type = #tpu.core_type<tc>, window_params = [{transform_indices = @transform_0, window_bounds = array<i64: 16, 32>}, {transform_indices = @transform_1, window_bounds = array<i64: 32, 32>}, {transform_indices = @transform_2, window_bounds = array<i64: 1, 32>}, {transform_indices = @transform_3, window_bounds = array<i64: 16, 32>}]} {
    %c0_i32 = arith.constant 0 : i32
    %0 = arith.cmpi eq, %arg2, %c0_i32 : i32
    %1 = arith.extui %0 : i1 to i32
    %c0_i32_0 = arith.constant 0 : i32
    %2 = arith.cmpi ne, %1, %c0_i32_0 : i32
    scf.if %2 {
      %cst_10 = arith.constant 0.000000e+00 : f32
      %14 = vector.broadcast %cst_10 : f32 to vector<16x32xf32>
      %c0_11 = arith.constant 0 : index
      %c0_12 = arith.constant 0 : index
      %15 = vector.load %arg7[%c0_11, %c0_12] : memref<16x32xf32, #tpu.memory_space<vmem>>, vector<16x32xf32>
      tpu.vector_store %arg7[%c0_11, %c0_12], %14 {strides = array<i32>} : memref<16x32xf32, #tpu.memory_space<vmem>>, vector<16x32xf32>,
    } else {
    }
    %c0 = arith.constant 0 : index
    %c0_1 = arith.constant 0 : index
    %3 = vector.load %arg7[%c0, %c0_1] : memref<16x32xf32, #tpu.memory_space<vmem>>, vector<16x32xf32>
    %c0_2 = arith.constant 0 : index
    %c0_3 = arith.constant 0 : index
    %4 = vector.load %arg3[%c0_2, %c0_3] : memref<16x32xf32, #tpu.memory_space<vmem>>, vector<16x32xf32>
    %5 = arith.truncf %4 : vector<16x32xf32> to vector<16x32xbf16>
    %c0_4 = arith.constant 0 : index
    %c0_5 = arith.constant 0 : index
    %6 = vector.load %arg4[%c0_4, %c0_5] : memref<32x32xf32, #tpu.memory_space<vmem>>, vector<32x32xf32>
    %7 = arith.truncf %6 : vector<32x32xf32> to vector<32x32xbf16>
    %cst = arith.constant dense<0.000000e+00> : vector<16x32xf32>
    %8 = tpu.matmul %5, %7, %cst {dimension_numbers = #tpu.dot_dimension_numbers<[1], [0], [0], [1], [0, 0, 1, 1], [], []>} : vector<16x32xbf16>, vector<32x32xbf16>, vector<16x32xf32> -> vector<16x32xf32>
    %9 = arith.addf %3, %8 : vector<16x32xf32>
    %c0_6 = arith.constant 0 : index
    %c0_7 = arith.constant 0 : index
    %10 = vector.load %arg7[%c0_6, %c0_7] : memref<16x32xf32, #tpu.memory_space<vmem>>, vector<16x32xf32>
    tpu.vector_store %arg7[%c0_6, %c0_7], %9 {strides = array<i32>} : memref<16x32xf32, #tpu.memory_space<vmem>>, vector<16x32xf32>,
    %c0_i32_8 = arith.constant 0 : i32
    %11 = arith.cmpi eq, %arg2, %c0_i32_8 : i32
    %12 = arith.extui %11 : i1 to i32
    %c0_i32_9 = arith.constant 0 : i32
    %13 = arith.cmpi ne, %12, %c0_i32_9 : i32
    scf.if %13 {
      %c0_10 = arith.constant 0 : index
      %c0_11 = arith.constant 0 : index
      %14 = vector.load %arg7[%c0_10, %c0_11] : memref<16x32xf32, #tpu.memory_space<vmem>>, vector<16x32xf32>
      %c0_12 = arith.constant 0 : index
      %c0_13 = arith.constant 0 : index
      %15 = vector.load %arg5[%c0_12, %c0_13] : memref<1x32xf32, #tpu.memory_space<vmem>>, vector<1x32xf32>
      %16 = vector.broadcast %15 : vector<1x32xf32> to vector<16x32xf32>
      %17 = arith.addf %14, %16 : vector<16x32xf32>
      %c0_14 = arith.constant 0 : index
      %c0_15 = arith.constant 0 : index
      %18 = vector.load %arg6[%c0_14, %c0_15] : memref<16x32xf32, #tpu.memory_space<vmem>>, vector<16x32xf32>
      tpu.vector_store %arg6[%c0_14, %c0_15], %17 {strides = array<i32>} : memref<16x32xf32, #tpu.memory_space<vmem>>, vector<16x32xf32>,
    } else {
    }
    return
  }
  func.func @transform_0(%arg0: i32, %arg1: i32, %arg2: i32) -> (i32, i32) {
    %c0_i32 = arith.constant 0 : i32
    return %arg0, %arg2 : i32, i32
  }
  func.func @transform_1(%arg0: i32, %arg1: i32, %arg2: i32) -> (i32, i32) {
    %c0_i32 = arith.constant 0 : i32
    return %arg2, %arg1 : i32, i32
  }
  func.func @transform_2(%arg0: i32, %arg1: i32, %arg2: i32) -> (i32, i32) {
    %c0_i32 = arith.constant 0 : i32
    %c0_i32_0 = arith.constant 0 : i32
    return %c0_i32, %arg1 : i32, i32
  }
  func.func @transform_3(%arg0: i32, %arg1: i32, %arg2: i32) -> (i32, i32) {
    %c0_i32 = arith.constant 0 : i32
    return %arg0, %arg1 : i32, i32
  }
}

</mosaic_0001>

<bundles_post_ra>
// kernel: tpu_custom_call.1
= control target key start
LH: loop header
LB: loop body
LE: loop exit
PB: predicated region body
PF: predicated region fallthrough
CT: control target
= control target key end

     0   :  { %8 = vsyncpa [#allocation4], 0  ;;  %s261_s0 = inlined_call_operand.hbm [shape: f32[16,32], index: 0, kind: input, shape index: {}]   ;;  %s262_s1 = inlined_call_operand.hbm [shape: f32[32,32], index: 1, kind: input, shape index: {}]   ;;  %s263_s2 = inlined_call_operand.vmem [shape: f32[1,32], index: 2, kind: input, shape index: {}]   ;;  %s264_s3 = inlined_call_operand.hbm [shape: f32[16,32], index: 3, kind: output, shape index: {}]  }
   0x1   :  { %9 = vsyncpa [#allocation7], 0 }
   0x2   :  { %10 = vsyncpa [#allocation5], 0  ;;  %s15_s14 = sshll.u32 %s261_s0, 4  ;;  %s207_s15 = smov [#allocation3]   ;;  %s16_s14 = int_to_ptr.hbm [resolvable:$true] %s15_s14 }
   0x3   :  { %s17_s16 = sshll.u32 %s207_s15, 4  ;;  %s28_s19 = sshll.u32 %s262_s1, 4  ;;  %s18_s16 = int_to_ptr.vmem [resolvable:$true] %s17_s16  ;;  %s29_s19 = int_to_ptr.hbm [resolvable:$true] %s28_s19 }
   0x4   :  { %s208_s20 = smov 128   ;;  %s209_s21 = smov 8  }
   0x5   :  { %23 = dma.hbm_to_vmem [thread:$0]  %s16_s14, 256, %s18_s16, [#allocation4], %s208_s20, %s208_s20, %s209_s21  }
   0x6   :  { %s210_s22 = smov [#allocation6]  }
   0x7   :  { %s30_s23 = sshll.u32 %s210_s22, 4  ;;  %s31_s23 = int_to_ptr.vmem [resolvable:$true] %s30_s23 }
   0x8   :  { %36 = dma.hbm_to_vmem [thread:$0]  %s29_s19, 512, %s31_s23, [#allocation7], %s208_s20, %s208_s20, %s209_s21  }
   0x9   :  { %201 = dma.done.wait [#allocation4], 256  }
   0xa   :  { %202 = vsyncadd [#allocation4], 4294967040 }
   0xb   :  { %203 = dma.done.wait [#allocation7], 512  }
   0xc   :  { %204 = vsyncadd [#allocation7], 4294966784  ;;  %vm52_vm0 = vcmask 261120   ;;  %v211_v0 = vmov 0.0   ;;  %v62_v1 = vld [vmem:[#allocation6 + $0x10] sm:$0xff]  ;;  %v63_v2 = vld [vmem:[#allocation6 + $0x18] sm:$0xff] }
   0xd   :  { %53 = vst.msk [vmem:[#allocation2] sm:$0xff] %vm52_vm0, %v211_v0  ;;  %v60_v3 = vld [vmem:[#allocation6] sm:$0xff]  ;;  %v65_v4 = vpack.c.bf16 %v63_v2, %v62_v1  ;;  %v61_v5 = vld [vmem:[#allocation6 + $0x8] sm:$0xff]  ;;  %v57_v7 = vld [vmem:[#allocation3] sm:$0xff]  ;;  %s212_s24 = smov [#allocation8]   ;;  %s107_s28 = sshll.u32 %s264_s3, 4  ;;  %s108_s28 = int_to_ptr.hbm [resolvable:$true] %s107_s28 }
   0xe   :  { %54 = vst.msk [vmem:[#allocation2 + $0x8] sm:$0xff] %vm52_vm0, %v211_v0  ;;  %v64_v6 = vpack.c.bf16 %v61_v5, %v60_v3  ;;  %v58_v8 = vld [vmem:[#allocation3 + $0x8] sm:$0xff]  ;;  %v128_v14 = vld [vmem:[%s263_s2] ss:$0 sm:$0xff]  ;;  %s105_s25 = sshll.u32 %s212_s24, 4  ;;  %s106_s25 = int_to_ptr.vmem [resolvable:$true] %s105_s25 }
   0xf   :  { %76 = vmatpush.bf16.msra.mxu0 %v65_v4  ;;  %v59_v9 = vpack.c.bf16 %v58_v8, %v57_v7 }
  0x13   :  { %77 = vmatpush.bf16.msra.mxu0 %v64_v6 }
  0x14   :  { %v55_v10 = vld [vmem:[#allocation2] sm:$0xff] }
  0x15   :  { %v56_v13 = vld [vmem:[#allocation2 + $0x8] sm:$0xff] }
  0x16   :  { %121 = vmatmul.msk.bf16.vlgmr.msra.gmra.mxu0 %vm52_vm0, %v59_v9 }
  0x93   :  { %v79_v11 = vpop.f32.mrf.mxu0 }
  0x94   :  { %v84_v12 = vadd.f32 %v79_v11, %v55_v10 }
  0x96   :  { %86 = vst.msk [vmem:[#allocation2] sm:$0xff] %vm52_vm0, %v84_v12 }
  0x9b   :  { %v81_v15 = vpop.f32.mrf.mxu0 }
  0x9c   :  { %v85_v16 = vadd.f32 %v81_v15, %v56_v13 }
  0x9d   :  { %v91_v17 = vld [vmem:[#allocation2] sm:$0xff] }
  0x9e   :  { %87 = vst.msk [vmem:[#allocation2 + $0x8] sm:$0xff] %vm52_vm0, %v85_v16  ;;  %v97_v18 = vadd.f32 %v128_v14, %v91_v17 }
  0xa0   :  { %99 = vst.msk [vmem:[#allocation8] sm:$0xff] %vm52_vm0, %v97_v18 }
  0xa5   :  { %v92_v19 = vld [vmem:[#allocation2 + $0x8] sm:$0xff] }
  0xa6   :  { %v98_v20 = vadd.f32 %v128_v14, %v92_v19 }
  0xa8   :  { %100 = vst.msk [vmem:[#allocation8 + $0x8] sm:$0xff] %vm52_vm0, %v98_v20 }
  0xa9   :  { %113 = dma.vmem_to_hbm [thread:$0]  %s106_s25, 256, %s108_s28, [#allocation5], %s208_s20, %s208_s20, %s209_s21  }
  0xaa   :  { %205 = dma.done.wait [#allocation5], 256  }
  0xab   :  { %206 = vsyncadd [#allocation5], 4294967040 }
  0xac   :  { %118 = vsyncpa [#allocation4], 1 }
  0xad   :  { %119 = vsyncpa [#allocation7], 1 }
  0xae   :  { %120 = vsyncpa [#allocation5], 1 }

</bundles_post_ra>
